<compile_context>
chip_gen: v6e
topology: v6e:2x2x1
jax: 0.10.0
libtpu: 0.0.40
codegen_flags: <defaults>
</compile_context>

<pallas_src>
import functools

import jax
import jax.numpy as jnp
from jax.experimental import pallas as pl
from jax.experimental.pallas import tpu as pltpu

_DEFAULT_TILE_ROWS = 8192   # matrices per grid step (rows of the (B, 9) view)
_MIN_TILE_ROWS = 512        # floor so tiles stay large enough to amortize
                            # the ~0.35 us per-grid-step overhead
_VMEM_LIMIT_BYTES = 40 * 1024 * 1024


def _round_up(x, m):
    return ((x + m - 1) // m) * m


def _geodesic_cos_kernel(m1_ref, m2_ref, cos_ref, *, eps):
    # (TBR, 9) blocks; batch on the sublane axis, the 9 matrix elements on the
    # lane axis (lane-sparse compute, but the kernel is HBM-bound).
    a = m1_ref[...].astype(jnp.float32)
    b = m2_ref[...].astype(jnp.float32)
    # Per-matrix trace(m1 @ m2^T) == sum of elementwise products.
    trace = jnp.sum(a * b, axis=1, keepdims=True)          # (TBR, 1)
    cos = (trace - 1.0) * 0.5
    cos_ref[...] = jnp.clip(cos, -1.0 + eps, 1.0 - eps)    # clamped cosine


def geodesic_loss(m1, m2, eps=1e-7, tile_rows=_DEFAULT_TILE_ROWS):
    assert m1.shape == m2.shape and m1.shape[1:] == (3, 3)
    b = m1.shape[0]

    # Free reshapes: (B, 3, 3) and (B, 9) share the same row-major layout, so
    # no extra HBM pass and no extra XLA op is materialized.
    m1f = jnp.reshape(m1, (b, 9))
    m2f = jnp.reshape(m2, (b, 9))

    # Tile rows: multiple of 8 (sublane constraint), never larger than the
    # (8-rounded) batch, and split in two once B > _MIN_TILE_ROWS so the
    # "parallel" grid axis has >= 2 steps for v7x's two TensorCores.
    tile_rows = _round_up(max(int(tile_rows), 8), 8)
    half = max(_MIN_TILE_ROWS, _round_up(pl.cdiv(b, 2), 8))
    tbr = min(tile_rows, _round_up(b, 8), half)
    num_tiles = pl.cdiv(b, tbr)

    itemsize = jnp.dtype(m1.dtype).itemsize
    cost = pl.CostEstimate(
        flops=17 * b,                                # 9 mul + 8 add per matrix
        transcendentals=0,
        bytes_accessed=2 * b * 9 * itemsize + 4 * b,
    )

    kernel = functools.partial(_geodesic_cos_kernel, eps=eps)
    cos_col = pl.pallas_call(
        kernel,
        out_shape=jax.ShapeDtypeStruct((num_tiles * tbr, 1), jnp.float32),
        grid=(num_tiles,),
        in_specs=[
            pl.BlockSpec((tbr, 9), lambda i: (i, 0)),
            pl.BlockSpec((tbr, 9), lambda i: (i, 0)),
        ],
        out_specs=pl.BlockSpec((tbr, 1), lambda i: (i, 0)),
        compiler_params=pltpu.CompilerParams(
            dimension_semantics=("parallel",),       # no accumulator
            vmem_limit_bytes=_VMEM_LIMIT_BYTES,
        ),
        cost_estimate=cost,
    )(m1f, m2f)

    # Tail rows of the final tile are unspecified garbage (clamped, never NaN
    # after the slice below) -- drop them before the arccos/mean epilogue.
    cos = cos_col[:b, 0]
    theta = jnp.arccos(cos)
    return jnp.mean(theta)


def _geodesic_loss_ref(m1, m2, eps=1e-7):
    # Pure-JAX reference mirroring the PyTorch forward.
    m = jnp.einsum("bij,bkj->bik", m1, m2, precision=jax.lax.Precision.HIGHEST)
    cos = (m[:, 0, 0] + m[:, 1, 1] + m[:, 2, 2] - 1.0) / 2.0
    theta = jnp.arccos(jnp.clip(cos, -1.0 + eps, 1.0 - eps))
    return jnp.mean(theta)


if __name__ == "__main__":
    key = jax.random.PRNGKey(0)
    # 203: single partial tile (tail rows).  1030: two tiles -> exercises the
    # "parallel" multi-step grid path and the last-tile tail handling.
    for bsz in (203, 1030):
        k1, k2 = jax.random.split(jax.random.fold_in(key, bsz))
        m1 = jax.random.normal(k1, (bsz, 3, 3), dtype=jnp.float32)
        m2 = jax.random.normal(k2, (bsz, 3, 3), dtype=jnp.float32)

        loss = jax.jit(geodesic_loss)(m1, m2)
        jax.block_until_ready(loss)

        ref = _geodesic_loss_ref(m1, m2)
        assert jnp.allclose(loss, ref, atol=1e-5, rtol=1e-5), (bsz, loss, ref)

    print("KERNEL_OK")
</pallas_src>

<mosaic_0001>
module attributes {stable_mosaic.version = 11 : i64} {
  func.func @_geodesic_cos_kernel(%arg0: i32, %arg1: memref<208x9xf32, #tpu.memory_space<vmem>>, %arg2: memref<208x9xf32, #tpu.memory_space<vmem>>, %arg3: memref<208x1xf32, #tpu.memory_space<vmem>>) attributes {dimension_semantics = [#tpu.dimension_semantics<parallel>], iteration_bounds = array<i64: 1>, scalar_prefetch = 0 : i64, scratch_operands = 0 : i64, tpu.core_type = #tpu.core_type<tc>, window_params = [{transform_indices = @transform_0, window_bounds = array<i64: 208, 9>}, {transform_indices = @transform_1, window_bounds = array<i64: 208, 9>}, {transform_indices = @transform_2, window_bounds = array<i64: 208, 1>}]} {
    %c0 = arith.constant 0 : index
    %c0_0 = arith.constant 0 : index
    %0 = vector.load %arg1[%c0, %c0_0] : memref<208x9xf32, #tpu.memory_space<vmem>>, vector<208x9xf32>
    %c0_1 = arith.constant 0 : index
    %c0_2 = arith.constant 0 : index
    %1 = vector.load %arg2[%c0_1, %c0_2] : memref<208x9xf32, #tpu.memory_space<vmem>>, vector<208x9xf32>
    %2 = arith.mulf %0, %1 : vector<208x9xf32>
    %cst = arith.constant dense<0.000000e+00> : vector<208xf32>
    %3 = vector.multi_reduction <add>, %2, %cst [1] : vector<208x9xf32> to vector<208xf32>
    %4 = vector.shape_cast %3 : vector<208xf32> to vector<208x1xf32>
    %cst_3 = arith.constant 1.000000e+00 : f32
    %5 = vector.broadcast %cst_3 : f32 to vector<208x1xf32>
    %6 = arith.subf %4, %5 : vector<208x1xf32>
    %cst_4 = arith.constant 5.000000e-01 : f32
    %7 = vector.broadcast %cst_4 : f32 to vector<208x1xf32>
    %8 = arith.mulf %6, %7 : vector<208x1xf32>
    %cst_5 = arith.constant -0.99999988 : f32
    %cst_6 = arith.constant 0.99999988 : f32
    %9 = vector.broadcast %cst_5 : f32 to vector<208x1xf32>
    %10 = arith.maximumf %9, %8 : vector<208x1xf32>
    %11 = vector.broadcast %cst_6 : f32 to vector<208x1xf32>
    %12 = arith.minimumf %11, %10 : vector<208x1xf32>
    %c0_7 = arith.constant 0 : index
    %c0_8 = arith.constant 0 : index
    %13 = vector.load %arg3[%c0_7, %c0_8] : memref<208x1xf32, #tpu.memory_space<vmem>>, vector<208x1xf32>
    tpu.vector_store %arg3[%c0_7, %c0_8], %12 {strides = array<i32>} : memref<208x1xf32, #tpu.memory_space<vmem>>, vector<208x1xf32>,
    return
  }
  func.func @transform_0(%arg0: i32) -> (i32, i32) {
    %c0_i32 = arith.constant 0 : i32
    %c0_i32_0 = arith.constant 0 : i32
    return %arg0, %c0_i32 : i32, i32
  }
  func.func @transform_1(%arg0: i32) -> (i32, i32) {
    %c0_i32 = arith.constant 0 : i32
    %c0_i32_0 = arith.constant 0 : i32
    return %arg0, %c0_i32 : i32, i32
  }
  func.func @transform_2(%arg0: i32) -> (i32, i32) {
    %c0_i32 = arith.constant 0 : i32
    %c0_i32_0 = arith.constant 0 : i32
    return %arg0, %c0_i32 : i32, i32
  }
}

</mosaic_0001>

<bundles_post_ra>
// kernel: geodesic_loss.1
= control target key start
LH: loop header
LB: loop body
LE: loop exit
PB: predicated region body
PF: predicated region fallthrough
CT: control target
= control target key end

     0   :  { %vm89_vm0 = vcmask 72704   ;;  %vm272_vm1 = vcmask 7168   ;;  %s656_s0 = inlined_call_operand.vmem [shape: f32[203,9], index: 0, kind: input, shape index: {}]   ;;  %s657_s1 = inlined_call_operand.vmem [shape: f32[203,9], index: 1, kind: input, shape index: {}]   ;;  %s658_s2 = inlined_call_operand.vmem [shape: f32[208,1], index: 2, kind: output, shape index: {}]  }
   0x1   :  { %v13_v0 = vld [vmem:[%s656_s0 + $0x10] sm:$0xff]  ;;  %v11_v2 = vld [vmem:[%s656_s0] sm:$0xff]  ;;  %v14_v5 = vld [vmem:[%s656_s0 + $0x18] sm:$0xff] }
   0x2   :  { %v39_v1 = vld [vmem:[%s657_s1 + $0x10] sm:$0xff]  ;;  %v37_v4 = vld [vmem:[%s657_s1] sm:$0xff]  ;;  %v40_v6 = vld [vmem:[%s657_s1 + $0x18] sm:$0xff] }
   0x3   :  { %v65_v3 = vmul.f32 %v39_v1, %v13_v0  ;;  %v63_v7 = vmul.f32 %v37_v4, %v11_v2  ;;  %v66_v8 = vmul.f32 %v40_v6, %v14_v5  ;;  %v12_v9 = vld [vmem:[%s656_s0 + $0x8] sm:$0xff]  ;;  %v15_v15 = vld [vmem:[%s656_s0 + $0x20] sm:$0xff]  ;;  %v18_v22 = vld [vmem:[%s656_s0 + $0x38] sm:$0xff] }
   0x4   :  { %v38_v10 = vld [vmem:[%s657_s1 + $0x8] sm:$0xff]  ;;  %v41_v16 = vld [vmem:[%s657_s1 + $0x20] sm:$0xff]  ;;  %v44_v23 = vld [vmem:[%s657_s1 + $0x38] sm:$0xff] }
   0x5   :  { %v16_v11 = vld [vmem:[%s656_s0 + $0x28] sm:$0xff]  ;;  %v96_v12 = vsel %vm89_vm0, %v65_v3, 0.0  ;;  %v64_v13 = vmul.f32 %v38_v10, %v12_v9  ;;  %v90_v17 = vsel %vm89_vm0, %v63_v7, 0.0  ;;  %v99_v18 = vsel %vm89_vm0, %v66_v8, 0.0  ;;  %v17_v24 = vld [vmem:[%s656_s0 + $0x30] sm:$0xff]  ;;  %v19_v32 = vld [vmem:[%s656_s0 + $0x40] sm:$0xff] }
   0x6   :  { %v42_v14 = vld [vmem:[%s657_s1 + $0x28] sm:$0xff]  ;;  %97 = vadd.xlane.f32.xlu1 %v96_v12  ;;  %91 = vadd.xlane.f32.xlu0 %v90_v17  ;;  %v67_v21 = vmul.f32 %v41_v16, %v15_v15  ;;  %v43_v25 = vld [vmem:[%s657_s1 + $0x30] sm:$0xff]  ;;  %v70_v27 = vmul.f32 %v44_v23, %v18_v22  ;;  %v45_v33 = vld [vmem:[%s657_s1 + $0x40] sm:$0xff] }
   0x7   :  { %v68_v19 = vmul.f32 %v42_v14, %v16_v11  ;;  %v93_v20 = vsel %vm89_vm0, %v64_v13, 0.0  ;;  %v69_v29 = vmul.f32 %v43_v25, %v17_v24  ;;  %v20_v30 = vld [vmem:[%s656_s0 + $0x48] sm:$0xff]  ;;  %v71_v37 = vmul.f32 %v45_v33, %v19_v32  ;;  %v22_v38 = vld [vmem:[%s656_s0 + $0x58] sm:$0xff]  ;;  %v21_v40 = vld [vmem:[%s656_s0 + $0x50] sm:$0xff] }
   0x8   :  { %v102_v28 = vsel %vm89_vm0, %v67_v21, 0.0  ;;  %v46_v31 = vld [vmem:[%s657_s1 + $0x48] sm:$0xff]  ;;  %v111_v34 = vsel %vm89_vm0, %v70_v27, 0.0  ;;  %v48_v39 = vld [vmem:[%s657_s1 + $0x58] sm:$0xff]  ;;  %v47_v41 = vld [vmem:[%s657_s1 + $0x50] sm:$0xff] }
   0x9   :  { %v105_v26 = vsel %vm89_vm0, %v68_v19, 0.0  ;;  %v72_v35 = vmul.f32 %v46_v31, %v20_v30  ;;  %v108_v36 = vsel %vm89_vm0, %v69_v29, 0.0  ;;  %v74_v43 = vmul.f32 %v48_v39, %v22_v38  ;;  %v24_v46 = vld [vmem:[%s656_s0 + $0x68] sm:$0xff]  ;;  %v23_v48 = vld [vmem:[%s656_s0 + $0x60] sm:$0xff]  ;;  %v26_v54 = vld [vmem:[%s656_s0 + $0x78] sm:$0xff] }
   0xa   :  { %100 = vadd.xlane.f32.xlu1 %v99_v18  ;;  %94 = vadd.xlane.f32.xlu0 %v93_v20  ;;  %v114_v44 = vsel %vm89_vm0, %v71_v37, 0.0  ;;  %v73_v45 = vmul.f32 %v47_v41, %v21_v40  ;;  %v50_v47 = vld [vmem:[%s657_s1 + $0x68] sm:$0xff]  ;;  %v49_v49 = vld [vmem:[%s657_s1 + $0x60] sm:$0xff]  ;;  %v52_v55 = vld [vmem:[%s657_s1 + $0x78] sm:$0xff] }
   0xb   :  { %v117_v42 = vsel %vm89_vm0, %v72_v35, 0.0  ;;  %v123_v50 = vsel %vm89_vm0, %v74_v43, 0.0  ;;  %v76_v51 = vmul.f32 %v50_v47, %v24_v46  ;;  %v75_v53 = vmul.f32 %v49_v49, %v23_v48  ;;  %v25_v56 = vld [vmem:[%s656_s0 + $0x70] sm:$0xff]  ;;  %v28_v62 = vld [vmem:[%s656_s0 + $0x88] sm:$0xff]  ;;  %v27_v0 = vld [vmem:[%s656_s0 + $0x80] sm:$0xff] }
   0xc   :  { %v120_v52 = vsel %vm89_vm0, %v73_v45, 0.0  ;;  %v51_v57 = vld [vmem:[%s657_s1 + $0x70] sm:$0xff]  ;;  %v78_v59 = vmul.f32 %v52_v55, %v26_v54  ;;  %v54_v63 = vld [vmem:[%s657_s1 + $0x88] sm:$0xff]  ;;  %v53_v1 = vld [vmem:[%s657_s1 + $0x80] sm:$0xff] }
   0xd   :  { %v129_v58 = vsel %vm89_vm0, %v76_v51, 0.0  ;;  %v126_v60 = vsel %vm89_vm0, %v75_v53, 0.0  ;;  %v77_v61 = vmul.f32 %v51_v57, %v25_v56  ;;  %v80_v3 = vmul.f32 %v54_v63, %v28_v62  ;;  %v30_v6 = vld [vmem:[%s656_s0 + $0x98] sm:$0xff]  ;;  %v29_v8 = vld [vmem:[%s656_s0 + $0x90] sm:$0xff]  ;;  %v32_v14 = vld [vmem:[%s656_s0 + $0xa8] sm:$0xff] }
   0xe   :  { %106 = vadd.xlane.f32.xlu1 %v105_v26  ;;  %103 = vadd.xlane.f32.xlu0 %v102_v28  ;;  %v135_v2 = vsel %vm89_vm0, %v78_v59, 0.0  ;;  %v79_v5 = vmul.f32 %v53_v1, %v27_v0  ;;  %v56_v7 = vld [vmem:[%s657_s1 + $0x98] sm:$0xff]  ;;  %v55_v9 = vld [vmem:[%s657_s1 + $0x90] sm:$0xff]  ;;  %v58_v15 = vld [vmem:[%s657_s1 + $0xa8] sm:$0xff] }
   0xf   :  { %v132_v4 = vsel %vm89_vm0, %v77_v61, 0.0  ;;  %v141_v10 = vsel %vm89_vm0, %v80_v3, 0.0  ;;  %v82_v11 = vmul.f32 %v56_v7, %v30_v6  ;;  %v81_v13 = vmul.f32 %v55_v9, %v29_v8  ;;  %v31_v16 = vld [vmem:[%s656_s0 + $0xa0] sm:$0xff]  ;;  %v34_v22 = vld [vmem:[%s656_s0 + $0xb8] sm:$0xff]  ;;  %v33_v24 = vld [vmem:[%s656_s0 + $0xb0] sm:$0xff] }
  0x10   :  { %v138_v12 = vsel %vm89_vm0, %v79_v5, 0.0  ;;  %v57_v17 = vld [vmem:[%s657_s1 + $0xa0] sm:$0xff]  ;;  %v84_v19 = vmul.f32 %v58_v15, %v32_v14  ;;  %v60_v23 = vld [vmem:[%s657_s1 + $0xb8] sm:$0xff]  ;;  %v59_v25 = vld [vmem:[%s657_s1 + $0xb0] sm:$0xff] }
  0x11   :  { %v147_v18 = vsel %vm89_vm0, %v82_v11, 0.0  ;;  %v144_v20 = vsel %vm89_vm0, %v81_v13, 0.0  ;;  %v83_v21 = vmul.f32 %v57_v17, %v31_v16  ;;  %v86_v27 = vmul.f32 %v60_v23, %v34_v22  ;;  %v36_v30 = vld [vmem:[%s656_s0 + $0xc8] sm:$0xff]  ;;  %v35_v32 = vld [vmem:[%s656_s0 + $0xc0] sm:$0xff] }
  0x12   :  { %112 = vadd.xlane.f32.xlu1 %v111_v34  ;;  %109 = vadd.xlane.f32.xlu0 %v108_v36  ;;  %v153_v26 = vsel %vm89_vm0, %v84_v19, 0.0  ;;  %v85_v29 = vmul.f32 %v59_v25, %v33_v24  ;;  %v62_v31 = vld [vmem:[%s657_s1 + $0xc8] sm:$0xff]  ;;  %v61_v33 = vld [vmem:[%s657_s1 + $0xc0] sm:$0xff] }
  0x13   :  { %v150_v28 = vsel %vm89_vm0, %v83_v21, 0.0  ;;  %v159_v34 = vsel %vm89_vm0, %v86_v27, 0.0  ;;  %v88_v35 = vmul.f32 %v62_v31, %v36_v30  ;;  %v87_v37 = vmul.f32 %v61_v33, %v35_v32 }
  0x14   :  { %v156_v36 = vsel %vm89_vm0, %v85_v29, 0.0 }
  0x15   :  { %v165_v38 = vsel %vm89_vm0, %v88_v35, 0.0  ;;  %v162_v39 = vsel %vm89_vm0, %v87_v37, 0.0 }
  0x16   :  { %118 = vadd.xlane.f32.xlu1 %v117_v42  ;;  %115 = vadd.xlane.f32.xlu0 %v114_v44 }
  0x1a   :  { %124 = vadd.xlane.f32.xlu1 %v123_v50  ;;  %121 = vadd.xlane.f32.xlu0 %v120_v52 }
  0x1e   :  { %130 = vadd.xlane.f32.xlu1 %v129_v58  ;;  %127 = vadd.xlane.f32.xlu0 %v126_v60 }
  0x22   :  { %136 = vadd.xlane.f32.xlu1 %v135_v2  ;;  %133 = vadd.xlane.f32.xlu0 %v132_v4 }
  0x26   :  { %142 = vadd.xlane.f32.xlu1 %v141_v10  ;;  %139 = vadd.xlane.f32.xlu0 %v138_v12 }
  0x2a   :  { %148 = vadd.xlane.f32.xlu1 %v147_v18  ;;  %145 = vadd.xlane.f32.xlu0 %v144_v20 }
  0x2e   :  { %154 = vadd.xlane.f32.xlu1 %v153_v26  ;;  %151 = vadd.xlane.f32.xlu0 %v150_v28 }
  0x32   :  { %160 = vadd.xlane.f32.xlu1 %v159_v34  ;;  %157 = vadd.xlane.f32.xlu0 %v156_v36 }
  0x36   :  { %166 = vadd.xlane.f32.xlu1 %v165_v38  ;;  %163 = vadd.xlane.f32.xlu0 %v162_v39 }
  0x8f   :  { %v98_v40 = vpop.xlane.xlu1 %97  ;;  %v92_v42 = vpop.xlane.xlu0 %91 }
  0x90   :  { %v305_v41 = vadd.f32 -1.0, %v98_v40  ;;  %v303_v43 = vadd.f32 -1.0, %v92_v42 }
  0x92   :  { %v196_v44 = vmul.f32 0.5, %v305_v41  ;;  %v194_v45 = vmul.f32 0.5, %v303_v43 }
  0x93   :  { %v101_v46 = vpop.xlane.xlu1 %100  ;;  %v95_v49 = vpop.xlane.xlu0 %94 }
  0x94   :  { %v331_v47 = vclamps-f32 %v196_v44, 0.9999999  ;;  %v306_v48 = vadd.f32 -1.0, %v101_v46  ;;  %v329_v50 = vclamps-f32 %v194_v45, 0.9999999  ;;  %v304_v51 = vadd.f32 -1.0, %v95_v49 }
  0x96   :  { %275 = vst.msk [vmem:[%s658_s2 + $0x10] sm:$0xff] %vm272_vm1, %v331_v47  ;;  %v197_v52 = vmul.f32 0.5, %v306_v48  ;;  %273 = vst.msk [vmem:[%s658_s2] sm:$0xff] %vm272_vm1, %v329_v50  ;;  %v195_v53 = vmul.f32 0.5, %v304_v51 }
  0x97   :  { %v107_v54 = vpop.xlane.xlu1 %106  ;;  %v104_v57 = vpop.xlane.xlu0 %103 }
  0x98   :  { %v332_v55 = vclamps-f32 %v197_v52, 0.9999999  ;;  %v308_v56 = vadd.f32 -1.0, %v107_v54  ;;  %v330_v58 = vclamps-f32 %v195_v53, 0.9999999  ;;  %v307_v59 = vadd.f32 -1.0, %v104_v57 }
  0x9a   :  { %276 = vst.msk [vmem:[%s658_s2 + $0x18] sm:$0xff] %vm272_vm1, %v332_v55  ;;  %v199_v60 = vmul.f32 0.5, %v308_v56  ;;  %274 = vst.msk [vmem:[%s658_s2 + $0x8] sm:$0xff] %vm272_vm1, %v330_v58  ;;  %v198_v61 = vmul.f32 0.5, %v307_v59 }
  0x9b   :  { %v113_v62 = vpop.xlane.xlu1 %112  ;;  %v110_v1 = vpop.xlane.xlu0 %109 }
  0x9c   :  { %v334_v63 = vclamps-f32 %v199_v60, 0.9999999  ;;  %v310_v0 = vadd.f32 -1.0, %v113_v62  ;;  %v333_v2 = vclamps-f32 %v198_v61, 0.9999999  ;;  %v309_v3 = vadd.f32 -1.0, %v110_v1 }
  0x9e   :  { %278 = vst.msk [vmem:[%s658_s2 + $0x28] sm:$0xff] %vm272_vm1, %v334_v63  ;;  %v201_v4 = vmul.f32 0.5, %v310_v0  ;;  %277 = vst.msk [vmem:[%s658_s2 + $0x20] sm:$0xff] %vm272_vm1, %v333_v2  ;;  %v200_v5 = vmul.f32 0.5, %v309_v3 }
  0x9f   :  { %v119_v6 = vpop.xlane.xlu1 %118  ;;  %v116_v9 = vpop.xlane.xlu0 %115 }
  0xa0   :  { %v336_v7 = vclamps-f32 %v201_v4, 0.9999999  ;;  %v312_v8 = vadd.f32 -1.0, %v119_v6  ;;  %v335_v10 = vclamps-f32 %v200_v5, 0.9999999  ;;  %v311_v11 = vadd.f32 -1.0, %v116_v9 }
  0xa2   :  { %280 = vst.msk [vmem:[%s658_s2 + $0x38] sm:$0xff] %vm272_vm1, %v336_v7  ;;  %v203_v12 = vmul.f32 0.5, %v312_v8  ;;  %279 = vst.msk [vmem:[%s658_s2 + $0x30] sm:$0xff] %vm272_vm1, %v335_v10  ;;  %v202_v13 = vmul.f32 0.5, %v311_v11 }
  0xa3   :  { %v125_v14 = vpop.xlane.xlu1 %124  ;;  %v122_v17 = vpop.xlane.xlu0 %121 }
  0xa4   :  { %v338_v15 = vclamps-f32 %v203_v12, 0.9999999  ;;  %v314_v16 = vadd.f32 -1.0, %v125_v14  ;;  %v337_v18 = vclamps-f32 %v202_v13, 0.9999999  ;;  %v313_v19 = vadd.f32 -1.0, %v122_v17 }
  0xa6   :  { %282 = vst.msk [vmem:[%s658_s2 + $0x48] sm:$0xff] %vm272_vm1, %v338_v15  ;;  %v205_v20 = vmul.f32 0.5, %v314_v16  ;;  %281 = vst.msk [vmem:[%s658_s2 + $0x40] sm:$0xff] %vm272_vm1, %v337_v18  ;;  %v204_v21 = vmul.f32 0.5, %v313_v19 }
  0xa7   :  { %v131_v22 = vpop.xlane.xlu1 %130  ;;  %v128_v25 = vpop.xlane.xlu0 %127 }
  0xa8   :  { %v340_v23 = vclamps-f32 %v205_v20, 0.9999999  ;;  %v316_v24 = vadd.f32 -1.0, %v131_v22  ;;  %v339_v26 = vclamps-f32 %v204_v21, 0.9999999  ;;  %v315_v27 = vadd.f32 -1.0, %v128_v25 }
  0xaa   :  { %284 = vst.msk [vmem:[%s658_s2 + $0x58] sm:$0xff] %vm272_vm1, %v340_v23  ;;  %v207_v28 = vmul.f32 0.5, %v316_v24  ;;  %283 = vst.msk [vmem:[%s658_s2 + $0x50] sm:$0xff] %vm272_vm1, %v339_v26  ;;  %v206_v29 = vmul.f32 0.5, %v315_v27 }
  0xab   :  { %v137_v30 = vpop.xlane.xlu1 %136  ;;  %v134_v33 = vpop.xlane.xlu0 %133 }
  0xac   :  { %v342_v31 = vclamps-f32 %v207_v28, 0.9999999  ;;  %v318_v32 = vadd.f32 -1.0, %v137_v30  ;;  %v341_v34 = vclamps-f32 %v206_v29, 0.9999999  ;;  %v317_v35 = vadd.f32 -1.0, %v134_v33 }
  0xae   :  { %286 = vst.msk [vmem:[%s658_s2 + $0x68] sm:$0xff] %vm272_vm1, %v342_v31  ;;  %v209_v36 = vmul.f32 0.5, %v318_v32  ;;  %285 = vst.msk [vmem:[%s658_s2 + $0x60] sm:$0xff] %vm272_vm1, %v341_v34  ;;  %v208_v37 = vmul.f32 0.5, %v317_v35 }
  0xaf   :  { %v143_v38 = vpop.xlane.xlu1 %142  ;;  %v140_v41 = vpop.xlane.xlu0 %139 }
  0xb0   :  { %v344_v39 = vclamps-f32 %v209_v36, 0.9999999  ;;  %v320_v40 = vadd.f32 -1.0, %v143_v38  ;;  %v343_v42 = vclamps-f32 %v208_v37, 0.9999999  ;;  %v319_v43 = vadd.f32 -1.0, %v140_v41 }
  0xb2   :  { %288 = vst.msk [vmem:[%s658_s2 + $0x78] sm:$0xff] %vm272_vm1, %v344_v39  ;;  %v211_v44 = vmul.f32 0.5, %v320_v40  ;;  %287 = vst.msk [vmem:[%s658_s2 + $0x70] sm:$0xff] %vm272_vm1, %v343_v42  ;;  %v210_v45 = vmul.f32 0.5, %v319_v43 }
  0xb3   :  { %v149_v46 = vpop.xlane.xlu1 %148  ;;  %v146_v49 = vpop.xlane.xlu0 %145 }
  0xb4   :  { %v346_v47 = vclamps-f32 %v211_v44, 0.9999999  ;;  %v322_v48 = vadd.f32 -1.0, %v149_v46  ;;  %v345_v50 = vclamps-f32 %v210_v45, 0.9999999  ;;  %v321_v51 = vadd.f32 -1.0, %v146_v49 }
  0xb6   :  { %290 = vst.msk [vmem:[%s658_s2 + $0x88] sm:$0xff] %vm272_vm1, %v346_v47  ;;  %v213_v52 = vmul.f32 0.5, %v322_v48  ;;  %289 = vst.msk [vmem:[%s658_s2 + $0x80] sm:$0xff] %vm272_vm1, %v345_v50  ;;  %v212_v53 = vmul.f32 0.5, %v321_v51 }
  0xb7   :  { %v155_v54 = vpop.xlane.xlu1 %154  ;;  %v152_v57 = vpop.xlane.xlu0 %151 }
  0xb8   :  { %v348_v55 = vclamps-f32 %v213_v52, 0.9999999  ;;  %v324_v56 = vadd.f32 -1.0, %v155_v54  ;;  %v347_v58 = vclamps-f32 %v212_v53, 0.9999999  ;;  %v323_v59 = vadd.f32 -1.0, %v152_v57 }
  0xba   :  { %292 = vst.msk [vmem:[%s658_s2 + $0x98] sm:$0xff] %vm272_vm1, %v348_v55  ;;  %v215_v60 = vmul.f32 0.5, %v324_v56  ;;  %291 = vst.msk [vmem:[%s658_s2 + $0x90] sm:$0xff] %vm272_vm1, %v347_v58  ;;  %v214_v61 = vmul.f32 0.5, %v323_v59 }
  0xbb   :  { %v161_v62 = vpop.xlane.xlu1 %160  ;;  %v158_v1 = vpop.xlane.xlu0 %157 }
  0xbc   :  { %v350_v63 = vclamps-f32 %v215_v60, 0.9999999  ;;  %v326_v0 = vadd.f32 -1.0, %v161_v62  ;;  %v349_v2 = vclamps-f32 %v214_v61, 0.9999999  ;;  %v325_v3 = vadd.f32 -1.0, %v158_v1 }
  0xbe   :  { %294 = vst.msk [vmem:[%s658_s2 + $0xa8] sm:$0xff] %vm272_vm1, %v350_v63  ;;  %v217_v4 = vmul.f32 0.5, %v326_v0  ;;  %293 = vst.msk [vmem:[%s658_s2 + $0xa0] sm:$0xff] %vm272_vm1, %v349_v2  ;;  %v216_v5 = vmul.f32 0.5, %v325_v3 }
  0xbf   :  { %v167_v6 = vpop.xlane.xlu1 %166  ;;  %v164_v9 = vpop.xlane.xlu0 %163 }
  0xc0   :  { %v352_v7 = vclamps-f32 %v217_v4, 0.9999999  ;;  %v328_v8 = vadd.f32 -1.0, %v167_v6  ;;  %v351_v10 = vclamps-f32 %v216_v5, 0.9999999  ;;  %v327_v11 = vadd.f32 -1.0, %v164_v9 }
  0xc2   :  { %296 = vst.msk [vmem:[%s658_s2 + $0xb8] sm:$0xff] %vm272_vm1, %v352_v7  ;;  %v219_v12 = vmul.f32 0.5, %v328_v8  ;;  %295 = vst.msk [vmem:[%s658_s2 + $0xb0] sm:$0xff] %vm272_vm1, %v351_v10  ;;  %v218_v13 = vmul.f32 0.5, %v327_v11 }
  0xc4   :  { %v354_v14 = vclamps-f32 %v219_v12, 0.9999999  ;;  %v353_v15 = vclamps-f32 %v218_v13, 0.9999999 }
  0xc6   :  { %298 = vst.msk [vmem:[%s658_s2 + $0xc8] sm:$0xff] %vm272_vm1, %v354_v14  ;;  %297 = vst.msk [vmem:[%s658_s2 + $0xc0] sm:$0xff] %vm272_vm1, %v353_v15 }

</bundles_post_ra>
